<compile_context>
chip_gen: v6e
topology: v6e:2x2x1
jax: 0.10.0
libtpu: 0.0.40
codegen_flags: <defaults>
</compile_context>

<pallas_src>
import functools

import jax
import jax.numpy as jnp
from jax import lax
from jax.experimental import pallas as pl
from jax.experimental.pallas import tpu as pltpu


def _make_conv_block_kernel(H, W, Cin, Cout, scale_input):
    """Builds a per-batch-element fused kernel for conv_block.forward."""
    HW = H * W

    def kernel(x_ref, w1_ref, s1_ref, b1_ref, w2_ref, s2_ref, b2_ref,
               ws_ref, bs_ref, o_ref, p1_ref, p2_ref):
        # x_ref  : (1, Cin, HW)     input, channel-major / pixel-on-lanes
        # w1_ref : (Cout, 9*Cin)    layer1 conv weights, tap-major contraction
        # s1/b1  : (Cout, 1)        layer1 folded BN scale / shift
        # w2_ref : (Cout, 9*Cout)   layer2 conv weights
        # s2/b2  : (Cout, 1)        layer2 folded BN scale / shift
        # ws_ref : (Cout, Cin)      1x1 residual-scale conv weight
        # bs_ref : (Cout, 1)        1x1 residual-scale conv bias
        # o_ref  : (1, Cout, HW)    output (lane-dense last dim)
        # p1_ref : VMEM (9*Cin, HW)  im2col patch, layer1
        # p2_ref : VMEM (9*Cout, HW) im2col patch, layer2

        # column index j (within a W-wide image row) for every lane position
        col = lax.broadcasted_iota(jnp.int32, (1, HW), 1) % W

        def build_patch(a, patch_ref):
            # a: (C, HW) activation.  Writes the transposed im2col matrix
            # (9*C, HW) so the whole 3x3 'same' conv becomes one MXU matmul
            # with contraction K = 9*C.
            C = a.shape[0]
            a = a.astype(patch_ref.dtype)
            # flat zero halo of W+1 on each side covers all out-of-image rows
            zpad = jnp.zeros((C, W + 1), patch_ref.dtype)
            ap = jnp.concatenate([zpad, a, zpad], axis=1)   # (C, HW + 2W + 2)
            for dy in range(3):
                for dx in range(3):
                    oy, ox = dy - 1, dx - 1
                    delta = oy * W + ox
                    # shifted[:, p] = a[:, p + delta] (zero when source row is
                    # outside the image, courtesy of the flat halo)
                    shifted = ap[:, W + 1 + delta: W + 1 + delta + HW]
                    if ox != 0:
                        # zero pixels whose source column wrapped across a row
                        valid = (col + ox >= 0) & (col + ox < W)
                        shifted = jnp.where(valid, shifted, 0.0)
                    t = dy * 3 + dx
                    patch_ref[t * C:(t + 1) * C, :] = shifted

        x = x_ref[0]                                        # (Cin, HW)

        # ---- layer1: conv3x3 (single matmul) + folded BN + ReLU ----
        build_patch(x, p1_ref)
        y1 = jnp.dot(w1_ref[...], p1_ref[...],
                     preferred_element_type=jnp.float32)    # (Cout, HW)
        y1 = jnp.maximum(y1 * s1_ref[...] + b1_ref[...], 0.0)

        # TODO(synk): nn.Dropout(p=0.01) is identity in eval mode; no RNG here.

        # ---- layer2: conv3x3 (single matmul) + folded BN + ReLU ----
        build_patch(y1, p2_ref)
        y2 = jnp.dot(w2_ref[...], p2_ref[...],
                     preferred_element_type=jnp.float32)    # (Cout, HW)
        y2 = jnp.maximum(y2 * s2_ref[...] + b2_ref[...], 0.0)

        # ---- residual path (1x1 conv + bias, or identity) ----
        if scale_input:
            res = jnp.dot(ws_ref[...], x.astype(ws_ref.dtype),
                          preferred_element_type=jnp.float32) + bs_ref[...]
        else:
            res = x.astype(jnp.float32)                     # requires Cin == Cout

        o_ref[0] = (y2 + res).astype(o_ref.dtype)

    return kernel


def conv_block_forward(x_nchw, params, *, scale_input=True, eps=1e-5,
                       compute_dtype=jnp.float32):
    """Pallas implementation of conv_block.forward. Input is NCHW (PyTorch)."""
    N, Cin, H, W = x_nchw.shape
    Cout = params["w1"].shape[0]          # PyTorch weight is (Cout, Cin, 3, 3)
    HW = H * W
    if not scale_input:
        assert Cin == Cout, "scale_input=False requires Cin == Cout"

    # NCHW -> (N, Cin, H*W): pure reshape, no transpose, no HBM padding copy.
    x = x_nchw.reshape(N, Cin, HW).astype(compute_dtype)

    # conv weights OIHW -> (Cout, tap*Cin) with tap = dy*3+dx (tap-major, matching
    # the patch row ordering built in-kernel).
    def taps2d(w_oihw):
        co, ci = w_oihw.shape[0], w_oihw.shape[1]
        return jnp.transpose(w_oihw, (0, 2, 3, 1)).reshape(co, 9 * ci) \
                  .astype(compute_dtype)

    w1 = taps2d(params["w1"])
    w2 = taps2d(params["w2"])

    def fold_bn(gamma, beta, mean, var):
        s = gamma / jnp.sqrt(var + eps)
        b = beta - mean * s
        return (s.reshape(Cout, 1).astype(jnp.float32),
                b.reshape(Cout, 1).astype(jnp.float32))

    s1, b1 = fold_bn(params["bn1_gamma"], params["bn1_beta"],
                     params["bn1_mean"], params["bn1_var"])
    s2, b2 = fold_bn(params["bn2_gamma"], params["bn2_beta"],
                     params["bn2_mean"], params["bn2_var"])

    if scale_input:
        ws = params["ws"][:, :, 0, 0].astype(compute_dtype)       # (Cout, Cin)
        bs = params["bs"].reshape(Cout, 1).astype(jnp.float32)
    else:
        ws = jnp.zeros((Cout, Cin), compute_dtype)
        bs = jnp.zeros((Cout, 1), jnp.float32)

    kernel = _make_conv_block_kernel(H, W, Cin, Cout, scale_input)

    out = pl.pallas_call(
        kernel,
        out_shape=jax.ShapeDtypeStruct((N, Cout, HW), jnp.float32),
        grid=(N,),
        in_specs=[
            pl.BlockSpec((1, Cin, HW), lambda n: (n, 0, 0)),
            pl.BlockSpec((Cout, 9 * Cin), lambda n: (0, 0)),
            pl.BlockSpec((Cout, 1), lambda n: (0, 0)),
            pl.BlockSpec((Cout, 1), lambda n: (0, 0)),
            pl.BlockSpec((Cout, 9 * Cout), lambda n: (0, 0)),
            pl.BlockSpec((Cout, 1), lambda n: (0, 0)),
            pl.BlockSpec((Cout, 1), lambda n: (0, 0)),
            pl.BlockSpec((Cout, Cin), lambda n: (0, 0)),
            pl.BlockSpec((Cout, 1), lambda n: (0, 0)),
        ],
        out_specs=pl.BlockSpec((1, Cout, HW), lambda n: (n, 0, 0)),
        scratch_shapes=[
            pltpu.VMEM((9 * Cin, HW), compute_dtype),   # layer1 im2col patch
            pltpu.VMEM((9 * Cout, HW), compute_dtype),  # layer2 im2col patch
        ],
        compiler_params=pltpu.CompilerParams(
            dimension_semantics=("parallel",)),
    )(x, w1, s1, b1, w2, s2, b2, ws, bs)

    # (N, Cout, H*W) -> NCHW, again a pure reshape.
    return out.reshape(N, Cout, H, W)


def conv_block_reference(x_nchw, params, *, scale_input=True, eps=1e-5):
    """Pure-JAX reference (lax.conv) mirroring the PyTorch eval-mode forward."""
    x = jnp.transpose(x_nchw, (0, 2, 3, 1)).astype(jnp.float32)  # NHWC

    def conv3x3(inp, w_oihw):
        w_hwio = jnp.transpose(w_oihw, (2, 3, 1, 0))
        return lax.conv_general_dilated(
            inp, w_hwio, window_strides=(1, 1), padding="SAME",
            dimension_numbers=("NHWC", "HWIO", "NHWC"))

    def bn_relu(inp, g, b, m, v):
        y = (inp - m) / jnp.sqrt(v + eps) * g + b
        return jnp.maximum(y, 0.0)

    y1 = bn_relu(conv3x3(x, params["w1"]), params["bn1_gamma"],
                 params["bn1_beta"], params["bn1_mean"], params["bn1_var"])
    y2 = bn_relu(conv3x3(y1, params["w2"]), params["bn2_gamma"],
                 params["bn2_beta"], params["bn2_mean"], params["bn2_var"])
    if scale_input:
        ws_hwio = jnp.transpose(params["ws"], (2, 3, 1, 0))
        res = lax.conv_general_dilated(
            x, ws_hwio, window_strides=(1, 1), padding="SAME",
            dimension_numbers=("NHWC", "HWIO", "NHWC")) + params["bs"]
    else:
        res = x
    out = y2 + res
    return jnp.transpose(out, (0, 3, 1, 2))


def init_params(key, cin, cout):
    ks = jax.random.split(key, 10)
    p = {
        "w1": 0.1 * jax.random.normal(ks[0], (cout, cin, 3, 3), jnp.float32),
        "w2": 0.1 * jax.random.normal(ks[1], (cout, cout, 3, 3), jnp.float32),
        "bn1_gamma": 1.0 + 0.1 * jax.random.normal(ks[2], (cout,), jnp.float32),
        "bn1_beta": 0.1 * jax.random.normal(ks[3], (cout,), jnp.float32),
        "bn1_mean": 0.1 * jax.random.normal(ks[4], (cout,), jnp.float32),
        "bn1_var": 1.0 + 0.1 * jax.random.uniform(ks[5], (cout,), jnp.float32),
        "bn2_gamma": 1.0 + 0.1 * jax.random.normal(ks[6], (cout,), jnp.float32),
        "bn2_beta": 0.1 * jax.random.normal(ks[7], (cout,), jnp.float32),
        "bn2_mean": 0.1 * jax.random.normal(ks[8], (cout,), jnp.float32),
        "bn2_var": 1.0 + 0.1 * jax.random.uniform(ks[9], (cout,), jnp.float32),
        "ws": 0.1 * jax.random.normal(jax.random.fold_in(key, 100),
                                      (cout, cin, 1, 1), jnp.float32),
        "bs": 0.1 * jax.random.normal(jax.random.fold_in(key, 101),
                                      (cout,), jnp.float32),
    }
    return p


if __name__ == "__main__":
    key = jax.random.PRNGKey(0)
    N, Cin, Cout, H, W = 2, 4, 8, 16, 16

    kx, kp = jax.random.split(key)
    x = jax.random.normal(kx, (N, Cin, H, W), jnp.float32)   # NCHW like PyTorch
    params = init_params(kp, Cin, Cout)

    # NOTE: on v6e/v7x, pass compute_dtype=jnp.bfloat16 for ~2x MXU/DMA wins
    # (f32 accumulate + f32 BN/ReLU epilogue are kept either way); f32 here so
    # the tight numerical check against the lax.conv reference holds.
    out = conv_block_forward(x, params, scale_input=True)
    out = jax.block_until_ready(out)

    ref = conv_block_reference(x, params, scale_input=True)
    ref = jax.block_until_ready(ref)

    assert out.shape == (N, Cout, H, W), out.shape
    assert jnp.allclose(out, ref, atol=1e-4, rtol=1e-4), \
        float(jnp.max(jnp.abs(out - ref)))

    print("KERNEL_OK")
</pallas_src>

<mosaic_0001>
module attributes {stable_mosaic.version = 11 : i64} {
  func.func @kernel(%arg0: i32, %arg1: memref<1x4x256xf32, #tpu.memory_space<vmem>>, %arg2: memref<8x36xf32, #tpu.memory_space<vmem>>, %arg3: memref<8x1xf32, #tpu.memory_space<vmem>>, %arg4: memref<8x1xf32, #tpu.memory_space<vmem>>, %arg5: memref<8x72xf32, #tpu.memory_space<vmem>>, %arg6: memref<8x1xf32, #tpu.memory_space<vmem>>, %arg7: memref<8x1xf32, #tpu.memory_space<vmem>>, %arg8: memref<8x4xf32, #tpu.memory_space<vmem>>, %arg9: memref<8x1xf32, #tpu.memory_space<vmem>>, %arg10: memref<1x8x256xf32, #tpu.memory_space<vmem>>, %arg11: memref<36x256xf32, #tpu.memory_space<vmem>>, %arg12: memref<72x256xf32, #tpu.memory_space<vmem>>) attributes {dimension_semantics = [#tpu.dimension_semantics<parallel>], iteration_bounds = array<i64: 2>, scalar_prefetch = 0 : i64, scratch_operands = 2 : i64, tpu.core_type = #tpu.core_type<tc>, window_params = [{transform_indices = @transform_0, window_bounds = array<i64: 1, 4, 256>}, {pipeline_mode = #tpu.pipeline_mode<synchronous>, transform_indices = @transform_1, window_bounds = array<i64: 8, 36>}, {pipeline_mode = #tpu.pipeline_mode<synchronous>, transform_indices = @transform_2, window_bounds = array<i64: 8, 1>}, {pipeline_mode = #tpu.pipeline_mode<synchronous>, transform_indices = @transform_3, window_bounds = array<i64: 8, 1>}, {pipeline_mode = #tpu.pipeline_mode<synchronous>, transform_indices = @transform_4, window_bounds = array<i64: 8, 72>}, {pipeline_mode = #tpu.pipeline_mode<synchronous>, transform_indices = @transform_5, window_bounds = array<i64: 8, 1>}, {pipeline_mode = #tpu.pipeline_mode<synchronous>, transform_indices = @transform_6, window_bounds = array<i64: 8, 1>}, {pipeline_mode = #tpu.pipeline_mode<synchronous>, transform_indices = @transform_7, window_bounds = array<i64: 8, 4>}, {pipeline_mode = #tpu.pipeline_mode<synchronous>, transform_indices = @transform_8, window_bounds = array<i64: 8, 1>}, {transform_indices = @transform_9, window_bounds = array<i64: 1, 8, 256>}]} {
    %0 = tpu.iota {dimensions = array<i32: 1>} : vector<1x256xi32>
    %c16_i32 = arith.constant 16 : i32
    %c0_i32 = arith.constant 0 : i32
    %1 = arith.cmpi eq, %c16_i32, %c0_i32 : i32
    %c1_i32 = arith.constant 1 : i32
    %2 = arith.select %1, %c1_i32, %c16_i32 : i32
    %3 = vector.broadcast %2 : i32 to vector<1x256xi32>
    %4 = arith.remsi %0, %3 : vector<1x256xi32>
    %c0_i32_0 = arith.constant 0 : i32
    %5 = vector.broadcast %c0_i32_0 : i32 to vector<1x256xi32>
    %6 = arith.cmpi ne, %4, %5 : vector<1x256xi32>
    %c0_i32_1 = arith.constant 0 : i32
    %7 = vector.broadcast %c0_i32_1 : i32 to vector<1x256xi32>
    %8 = arith.cmpi slt, %4, %7 : vector<1x256xi32>
    %c0_i32_2 = arith.constant 0 : i32
    %9 = arith.cmpi slt, %2, %c0_i32_2 : i32
    %10 = vector.broadcast %9 : i1 to vector<1x256xi1>
    %11 = vector.broadcast %10 : vector<1x256xi1> to vector<1x256xi1>
    %12 = arith.xori %8, %11 : vector<1x256xi1>
    %13 = arith.andi %12, %6 : vector<1x256xi1>
    %14 = vector.broadcast %2 : i32 to vector<1x256xi32>
    %15 = arith.addi %4, %14 : vector<1x256xi32>
    %16 = arith.select %13, %15, %4 : vector<1x256xi1>, vector<1x256xi32>
    %c0 = arith.constant 0 : index
    %c0_3 = arith.constant 0 : index
    %c0_4 = arith.constant 0 : index
    %17 = vector.load %arg1[%c0, %c0_3, %c0_4] : memref<1x4x256xf32, #tpu.memory_space<vmem>>, vector<1x4x256xf32>
    %18 = vector.shape_cast %17 : vector<1x4x256xf32> to vector<4x256xf32>
    %cst = arith.constant 0.000000e+00 : f32
    %19 = vector.broadcast %cst : f32 to vector<4x17xf32>
    %20 = tpu.concatenate %19, %18, %19 in 1 : vector<4x17xf32>, vector<4x256xf32>, vector<4x17xf32> -> vector<4x290xf32>
    %21 = vector.extract_strided_slice %20 {offsets = [0, 0], sizes = [4, 256], strides = [1, 1]} : vector<4x290xf32> to vector<4x256xf32>
    %c-1_i32 = arith.constant -1 : i32
    %22 = vector.broadcast %c-1_i32 : i32 to vector<1x256xi32>
    %23 = arith.addi %16, %22 : vector<1x256xi32>
    %c0_i32_5 = arith.constant 0 : i32
    %24 = vector.broadcast %c0_i32_5 : i32 to vector<1x256xi32>
    %25 = arith.cmpi sge, %23, %24 : vector<1x256xi32>
    %c-1_i32_6 = arith.constant -1 : i32
    %26 = vector.broadcast %c-1_i32_6 : i32 to vector<1x256xi32>
    %27 = arith.addi %16, %26 : vector<1x256xi32>
    %c16_i32_7 = arith.constant 16 : i32
    %28 = vector.broadcast %c16_i32_7 : i32 to vector<1x256xi32>
    %29 = arith.cmpi slt, %27, %28 : vector<1x256xi32>
    %30 = arith.andi %25, %29 : vector<1x256xi1>
    %cst_8 = arith.constant 0.000000e+00 : f32
    %31 = vector.shape_cast %30 : vector<1x256xi1> to vector<1x256xi1>
    %32 = vector.broadcast %31 : vector<1x256xi1> to vector<4x256xi1>
    %33 = vector.broadcast %cst_8 : f32 to vector<4x256xf32>
    %34 = arith.select %32, %21, %33 : vector<4x256xi1>, vector<4x256xf32>
    %c0_9 = arith.constant 0 : index
    %c0_10 = arith.constant 0 : index
    %35 = vector.load %arg11[%c0_9, %c0_10] : memref<36x256xf32, #tpu.memory_space<vmem>>, vector<4x256xf32>
    tpu.vector_store %arg11[%c0_9, %c0_10], %34 {strides = array<i32>} : memref<36x256xf32, #tpu.memory_space<vmem>>, vector<4x256xf32>,
    %36 = vector.extract_strided_slice %20 {offsets = [0, 1], sizes = [4, 256], strides = [1, 1]} : vector<4x290xf32> to vector<4x256xf32>
    %c4 = arith.constant 4 : index
    %c0_11 = arith.constant 0 : index
    %37 = vector.load %arg11[%c4, %c0_11] : memref<36x256xf32, #tpu.memory_space<vmem>>, vector<4x256xf32>
    tpu.vector_store %arg11[%c4, %c0_11], %36 {strides = array<i32>} : memref<36x256xf32, #tpu.memory_space<vmem>>, vector<4x256xf32>,
    %38 = vector.extract_strided_slice %20 {offsets = [0, 2], sizes = [4, 256], strides = [1, 1]} : vector<4x290xf32> to vector<4x256xf32>
    %c1_i32_12 = arith.constant 1 : i32
    %39 = vector.broadcast %c1_i32_12 : i32 to vector<1x256xi32>
    %40 = arith.addi %16, %39 : vector<1x256xi32>
    %c0_i32_13 = arith.constant 0 : i32
    %41 = vector.broadcast %c0_i32_13 : i32 to vector<1x256xi32>
    %42 = arith.cmpi sge, %40, %41 : vector<1x256xi32>
    %c1_i32_14 = arith.constant 1 : i32
    %43 = vector.broadcast %c1_i32_14 : i32 to vector<1x256xi32>
    %44 = arith.addi %16, %43 : vector<1x256xi32>
    %c16_i32_15 = arith.constant 16 : i32
    %45 = vector.broadcast %c16_i32_15 : i32 to vector<1x256xi32>
    %46 = arith.cmpi slt, %44, %45 : vector<1x256xi32>
    %47 = arith.andi %42, %46 : vector<1x256xi1>
    %cst_16 = arith.constant 0.000000e+00 : f32
    %48 = vector.shape_cast %47 : vector<1x256xi1> to vector<1x256xi1>
    %49 = vector.broadcast %48 : vector<1x256xi1> to vector<4x256xi1>
    %50 = vector.broadcast %cst_16 : f32 to vector<4x256xf32>
    %51 = arith.select %49, %38, %50 : vector<4x256xi1>, vector<4x256xf32>
    %c8 = arith.constant 8 : index
    %c0_17 = arith.constant 0 : index
    %52 = vector.load %arg11[%c8, %c0_17] : memref<36x256xf32, #tpu.memory_space<vmem>>, vector<4x256xf32>
    tpu.vector_store %arg11[%c8, %c0_17], %51 {strides = array<i32>} : memref<36x256xf32, #tpu.memory_space<vmem>>, vector<4x256xf32>,
    %53 = vector.extract_strided_slice %20 {offsets = [0, 16], sizes = [4, 256], strides = [1, 1]} : vector<4x290xf32> to vector<4x256xf32>
    %c-1_i32_18 = arith.constant -1 : i32
    %54 = vector.broadcast %c-1_i32_18 : i32 to vector<1x256xi32>
    %55 = arith.addi %16, %54 : vector<1x256xi32>
    %c0_i32_19 = arith.constant 0 : i32
    %56 = vector.broadcast %c0_i32_19 : i32 to vector<1x256xi32>
    %57 = arith.cmpi sge, %55, %56 : vector<1x256xi32>
    %c-1_i32_20 = arith.constant -1 : i32
    %58 = vector.broadcast %c-1_i32_20 : i32 to vector<1x256xi32>
    %59 = arith.addi %16, %58 : vector<1x256xi32>
    %c16_i32_21 = arith.constant 16 : i32
    %60 = vector.broadcast %c16_i32_21 : i32 to vector<1x256xi32>
    %61 = arith.cmpi slt, %59, %60 : vector<1x256xi32>
    %62 = arith.andi %57, %61 : vector<1x256xi1>
    %cst_22 = arith.constant 0.000000e+00 : f32
    %63 = vector.shape_cast %62 : vector<1x256xi1> to vector<1x256xi1>
    %64 = vector.broadcast %63 : vector<1x256xi1> to vector<4x256xi1>
    %65 = vector.broadcast %cst_22 : f32 to vector<4x256xf32>
    %66 = arith.select %64, %53, %65 : vector<4x256xi1>, vector<4x256xf32>
    %c12 = arith.constant 12 : index
    %c0_23 = arith.constant 0 : index
    %67 = vector.load %arg11[%c12, %c0_23] : memref<36x256xf32, #tpu.memory_space<vmem>>, vector<4x256xf32>
    tpu.vector_store %arg11[%c12, %c0_23], %66 {strides = array<i32>} : memref<36x256xf32, #tpu.memory_space<vmem>>, vector<4x256xf32>,
    %68 = vector.extract_strided_slice %20 {offsets = [0, 17], sizes = [4, 256], strides = [1, 1]} : vector<4x290xf32> to vector<4x256xf32>
    %c16 = arith.constant 16 : index
    %c0_24 = arith.constant 0 : index
    %69 = vector.load %arg11[%c16, %c0_24] : memref<36x256xf32, #tpu.memory_space<vmem>>, vector<4x256xf32>
    tpu.vector_store %arg11[%c16, %c0_24], %68 {strides = array<i32>} : memref<36x256xf32, #tpu.memory_space<vmem>>, vector<4x256xf32>,
    %70 = vector.extract_strided_slice %20 {offsets = [0, 18], sizes = [4, 256], strides = [1, 1]} : vector<4x290xf32> to vector<4x256xf32>
    %c1_i32_25 = arith.constant 1 : i32
    %71 = vector.broadcast %c1_i32_25 : i32 to vector<1x256xi32>
    %72 = arith.addi %16, %71 : vector<1x256xi32>
    %c0_i32_26 = arith.constant 0 : i32
    %73 = vector.broadcast %c0_i32_26 : i32 to vector<1x256xi32>
    %74 = arith.cmpi sge, %72, %73 : vector<1x256xi32>
    %c1_i32_27 = arith.constant 1 : i32
    %75 = vector.broadcast %c1_i32_27 : i32 to vector<1x256xi32>
    %76 = arith.addi %16, %75 : vector<1x256xi32>
    %c16_i32_28 = arith.constant 16 : i32
    %77 = vector.broadcast %c16_i32_28 : i32 to vector<1x256xi32>
    %78 = arith.cmpi slt, %76, %77 : vector<1x256xi32>
    %79 = arith.andi %74, %78 : vector<1x256xi1>
    %cst_29 = arith.constant 0.000000e+00 : f32
    %80 = vector.shape_cast %79 : vector<1x256xi1> to vector<1x256xi1>
    %81 = vector.broadcast %80 : vector<1x256xi1> to vector<4x256xi1>
    %82 = vector.broadcast %cst_29 : f32 to vector<4x256xf32>
    %83 = arith.select %81, %70, %82 : vector<4x256xi1>, vector<4x256xf32>
    %c20 = arith.constant 20 : index
    %c0_30 = arith.constant 0 : index
    %84 = vector.load %arg11[%c20, %c0_30] : memref<36x256xf32, #tpu.memory_space<vmem>>, vector<4x256xf32>
    tpu.vector_store %arg11[%c20, %c0_30], %83 {strides = array<i32>} : memref<36x256xf32, #tpu.memory_space<vmem>>, vector<4x256xf32>,
    %85 = vector.extract_strided_slice %20 {offsets = [0, 32], sizes = [4, 256], strides = [1, 1]} : vector<4x290xf32> to vector<4x256xf32>
    %c-1_i32_31 = arith.constant -1 : i32
    %86 = vector.broadcast %c-1_i32_31 : i32 to vector<1x256xi32>
    %87 = arith.addi %16, %86 : vector<1x256xi32>
    %c0_i32_32 = arith.constant 0 : i32
    %88 = vector.broadcast %c0_i32_32 : i32 to vector<1x256xi32>
    %89 = arith.cmpi sge, %87, %88 : vector<1x256xi32>
    %c-1_i32_33 = arith.constant -1 : i32
    %90 = vector.broadcast %c-1_i32_33 : i32 to vector<1x256xi32>
    %91 = arith.addi %16, %90 : vector<1x256xi32>
    %c16_i32_34 = arith.constant 16 : i32
    %92 = vector.broadcast %c16_i32_34 : i32 to vector<1x256xi32>
    %93 = arith.cmpi slt, %91, %92 : vector<1x256xi32>
    %94 = arith.andi %89, %93 : vector<1x256xi1>
    %cst_35 = arith.constant 0.000000e+00 : f32
    %95 = vector.shape_cast %94 : vector<1x256xi1> to vector<1x256xi1>
    %96 = vector.broadcast %95 : vector<1x256xi1> to vector<4x256xi1>
    %97 = vector.broadcast %cst_35 : f32 to vector<4x256xf32>
    %98 = arith.select %96, %85, %97 : vector<4x256xi1>, vector<4x256xf32>
    %c24 = arith.constant 24 : index
    %c0_36 = arith.constant 0 : index
    %99 = vector.load %arg11[%c24, %c0_36] : memref<36x256xf32, #tpu.memory_space<vmem>>, vector<4x256xf32>
    tpu.vector_store %arg11[%c24, %c0_36], %98 {strides = array<i32>} : memref<36x256xf32, #tpu.memory_space<vmem>>, vector<4x256xf32>,
    %100 = vector.extract_strided_slice %20 {offsets = [0, 33], sizes = [4, 256], strides = [1, 1]} : vector<4x290xf32> to vector<4x256xf32>
    %c28 = arith.constant 28 : index
    %c0_37 = arith.constant 0 : index
    %101 = vector.load %arg11[%c28, %c0_37] : memref<36x256xf32, #tpu.memory_space<vmem>>, vector<4x256xf32>
    tpu.vector_store %arg11[%c28, %c0_37], %100 {strides = array<i32>} : memref<36x256xf32, #tpu.memory_space<vmem>>, vector<4x256xf32>,
    %102 = vector.extract_strided_slice %20 {offsets = [0, 34], sizes = [4, 256], strides = [1, 1]} : vector<4x290xf32> to vector<4x256xf32>
    %c1_i32_38 = arith.constant 1 : i32
    %103 = vector.broadcast %c1_i32_38 : i32 to vector<1x256xi32>
    %104 = arith.addi %16, %103 : vector<1x256xi32>
    %c0_i32_39 = arith.constant 0 : i32
    %105 = vector.broadcast %c0_i32_39 : i32 to vector<1x256xi32>
    %106 = arith.cmpi sge, %104, %105 : vector<1x256xi32>
    %c1_i32_40 = arith.constant 1 : i32
    %107 = vector.broadcast %c1_i32_40 : i32 to vector<1x256xi32>
    %108 = arith.addi %16, %107 : vector<1x256xi32>
    %c16_i32_41 = arith.constant 16 : i32
    %109 = vector.broadcast %c16_i32_41 : i32 to vector<1x256xi32>
    %110 = arith.cmpi slt, %108, %109 : vector<1x256xi32>
    %111 = arith.andi %106, %110 : vector<1x256xi1>
    %cst_42 = arith.constant 0.000000e+00 : f32
    %112 = vector.shape_cast %111 : vector<1x256xi1> to vector<1x256xi1>
    %113 = vector.broadcast %112 : vector<1x256xi1> to vector<4x256xi1>
    %114 = vector.broadcast %cst_42 : f32 to vector<4x256xf32>
    %115 = arith.select %113, %102, %114 : vector<4x256xi1>, vector<4x256xf32>
    %c32 = arith.constant 32 : index
    %c0_43 = arith.constant 0 : index
    %116 = vector.load %arg11[%c32, %c0_43] : memref<36x256xf32, #tpu.memory_space<vmem>>, vector<4x256xf32>
    tpu.vector_store %arg11[%c32, %c0_43], %115 {strides = array<i32>} : memref<36x256xf32, #tpu.memory_space<vmem>>, vector<4x256xf32>,
    %c0_44 = arith.constant 0 : index
    %c0_45 = arith.constant 0 : index
    %117 = vector.load %arg2[%c0_44, %c0_45] : memref<8x36xf32, #tpu.memory_space<vmem>>, vector<8x36xf32>
    %c0_46 = arith.constant 0 : index
    %c0_47 = arith.constant 0 : index
    %118 = vector.load %arg11[%c0_46, %c0_47] : memref<36x256xf32, #tpu.memory_space<vmem>>, vector<36x256xf32>
    %cst_48 = arith.constant dense<0.000000e+00> : vector<8x256xf32>
    %119 = tpu.matmul %117, %118, %cst_48 {dimension_numbers = #tpu.dot_dimension_numbers<[1], [0], [0], [1], [0, 0, 1, 1], [], []>} : vector<8x36xf32>, vector<36x256xf32>, vector<8x256xf32> -> vector<8x256xf32>
    %c0_49 = arith.constant 0 : index
    %c0_50 = arith.constant 0 : index
    %120 = vector.load %arg3[%c0_49, %c0_50] : memref<8x1xf32, #tpu.memory_space<vmem>>, vector<8x1xf32>
    %121 = vector.broadcast %120 : vector<8x1xf32> to vector<8x256xf32>
    %122 = arith.mulf %119, %121 : vector<8x256xf32>
    %c0_51 = arith.constant 0 : index
    %c0_52 = arith.constant 0 : index
    %123 = vector.load %arg4[%c0_51, %c0_52] : memref<8x1xf32, #tpu.memory_space<vmem>>, vector<8x1xf32>
    %124 = vector.broadcast %123 : vector<8x1xf32> to vector<8x256xf32>
    %125 = arith.addf %122, %124 : vector<8x256xf32>
    %cst_53 = arith.constant 0.000000e+00 : f32
    %126 = vector.broadcast %cst_53 : f32 to vector<8x256xf32>
    %127 = arith.maximumf %125, %126 : vector<8x256xf32>
    %cst_54 = arith.constant 0.000000e+00 : f32
    %128 = vector.broadcast %cst_54 : f32 to vector<8x17xf32>
    %129 = tpu.concatenate %128, %127, %128 in 1 : vector<8x17xf32>, vector<8x256xf32>, vector<8x17xf32> -> vector<8x290xf32>
    %130 = vector.extract_strided_slice %129 {offsets = [0, 0], sizes = [8, 256], strides = [1, 1]} : vector<8x290xf32> to vector<8x256xf32>
    %c-1_i32_55 = arith.constant -1 : i32
    %131 = vector.broadcast %c-1_i32_55 : i32 to vector<1x256xi32>
    %132 = arith.addi %16, %131 : vector<1x256xi32>
    %c0_i32_56 = arith.constant 0 : i32
    %133 = vector.broadcast %c0_i32_56 : i32 to vector<1x256xi32>
    %134 = arith.cmpi sge, %132, %133 : vector<1x256xi32>
    %c-1_i32_57 = arith.constant -1 : i32
    %135 = vector.broadcast %c-1_i32_57 : i32 to vector<1x256xi32>
    %136 = arith.addi %16, %135 : vector<1x256xi32>
    %c16_i32_58 = arith.constant 16 : i32
    %137 = vector.broadcast %c16_i32_58 : i32 to vector<1x256xi32>
    %138 = arith.cmpi slt, %136, %137 : vector<1x256xi32>
    %139 = arith.andi %134, %138 : vector<1x256xi1>
    %cst_59 = arith.constant 0.000000e+00 : f32
    %140 = vector.shape_cast %139 : vector<1x256xi1> to vector<1x256xi1>
    %141 = vector.broadcast %140 : vector<1x256xi1> to vector<8x256xi1>
    %142 = vector.broadcast %cst_59 : f32 to vector<8x256xf32>
    %143 = arith.select %141, %130, %142 : vector<8x256xi1>, vector<8x256xf32>
    %c0_60 = arith.constant 0 : index
    %c0_61 = arith.constant 0 : index
    %144 = vector.load %arg12[%c0_60, %c0_61] : memref<72x256xf32, #tpu.memory_space<vmem>>, vector<8x256xf32>
    tpu.vector_store %arg12[%c0_60, %c0_61], %143 {strides = array<i32>} : memref<72x256xf32, #tpu.memory_space<vmem>>, vector<8x256xf32>,
    %145 = vector.extract_strided_slice %129 {offsets = [0, 1], sizes = [8, 256], strides = [1, 1]} : vector<8x290xf32> to vector<8x256xf32>
    %c8_62 = arith.constant 8 : index
    %c0_63 = arith.constant 0 : index
    %146 = vector.load %arg12[%c8_62, %c0_63] : memref<72x256xf32, #tpu.memory_space<vmem>>, vector<8x256xf32>
    tpu.vector_store %arg12[%c8_62, %c0_63], %145 {strides = array<i32>} : memref<72x256xf32, #tpu.memory_space<vmem>>, vector<8x256xf32>,
    %147 = vector.extract_strided_slice %129 {offsets = [0, 2], sizes = [8, 256], strides = [1, 1]} : vector<8x290xf32> to vector<8x256xf32>
    %c1_i32_64 = arith.constant 1 : i32
    %148 = vector.broadcast %c1_i32_64 : i32 to vector<1x256xi32>
    %149 = arith.addi %16, %148 : vector<1x256xi32>
    %c0_i32_65 = arith.constant 0 : i32
    %150 = vector.broadcast %c0_i32_65 : i32 to vector<1x256xi32>
    %151 = arith.cmpi sge, %149, %150 : vector<1x256xi32>
    %c1_i32_66 = arith.constant 1 : i32
    %152 = vector.broadcast %c1_i32_66 : i32 to vector<1x256xi32>
    %153 = arith.addi %16, %152 : vector<1x256xi32>
    %c16_i32_67 = arith.constant 16 : i32
    %154 = vector.broadcast %c16_i32_67 : i32 to vector<1x256xi32>
    %155 = arith.cmpi slt, %153, %154 : vector<1x256xi32>
    %156 = arith.andi %151, %155 : vector<1x256xi1>
    %cst_68 = arith.constant 0.000000e+00 : f32
    %157 = vector.shape_cast %156 : vector<1x256xi1> to vector<1x256xi1>
    %158 = vector.broadcast %157 : vector<1x256xi1> to vector<8x256xi1>
    %159 = vector.broadcast %cst_68 : f32 to vector<8x256xf32>
    %160 = arith.select %158, %147, %159 : vector<8x256xi1>, vector<8x256xf32>
    %c16_69 = arith.constant 16 : index
    %c0_70 = arith.constant 0 : index
    %161 = vector.load %arg12[%c16_69, %c0_70] : memref<72x256xf32, #tpu.memory_space<vmem>>, vector<8x256xf32>
    tpu.vector_store %arg12[%c16_69, %c0_70], %160 {strides = array<i32>} : memref<72x256xf32, #tpu.memory_space<vmem>>, vector<8x256xf32>,
    %162 = vector.extract_strided_slice %129 {offsets = [0, 16], sizes = [8, 256], strides = [1, 1]} : vector<8x290xf32> to vector<8x256xf32>
    %c-1_i32_71 = arith.constant -1 : i32
    %163 = vector.broadcast %c-1_i32_71 : i32 to vector<1x256xi32>
    %164 = arith.addi %16, %163 : vector<1x256xi32>
    %c0_i32_72 = arith.constant 0 : i32
    %165 = vector.broadcast %c0_i32_72 : i32 to vector<1x256xi32>
    %166 = arith.cmpi sge, %164, %165 : vector<1x256xi32>
    %c-1_i32_73 = arith.constant -1 : i32
    %167 = vector.broadcast %c-1_i32_73 : i32 to vector<1x256xi32>
    %168 = arith.addi %16, %167 : vector<1x256xi32>
    %c16_i32_74 = arith.constant 16 : i32
    %169 = vector.broadcast %c16_i32_74 : i32 to vector<1x256xi32>
    %170 = arith.cmpi slt, %168, %169 : vector<1x256xi32>
    %171 = arith.andi %166, %170 : vector<1x256xi1>
    %cst_75 = arith.constant 0.000000e+00 : f32
    %172 = vector.shape_cast %171 : vector<1x256xi1> to vector<1x256xi1>
    %173 = vector.broadcast %172 : vector<1x256xi1> to vector<8x256xi1>
    %174 = vector.broadcast %cst_75 : f32 to vector<8x256xf32>
    %175 = arith.select %173, %162, %174 : vector<8x256xi1>, vector<8x256xf32>
    %c24_76 = arith.constant 24 : index
    %c0_77 = arith.constant 0 : index
    %176 = vector.load %arg12[%c24_76, %c0_77] : memref<72x256xf32, #tpu.memory_space<vmem>>, vector<8x256xf32>
    tpu.vector_store %arg12[%c24_76, %c0_77], %175 {strides = array<i32>} : memref<72x256xf32, #tpu.memory_space<vmem>>, vector<8x256xf32>,
    %177 = vector.extract_strided_slice %129 {offsets = [0, 17], sizes = [8, 256], strides = [1, 1]} : vector<8x290xf32> to vector<8x256xf32>
    %c32_78 = arith.constant 32 : index
    %c0_79 = arith.constant 0 : index
    %178 = vector.load %arg12[%c32_78, %c0_79] : memref<72x256xf32, #tpu.memory_space<vmem>>, vector<8x256xf32>
    tpu.vector_store %arg12[%c32_78, %c0_79], %177 {strides = array<i32>} : memref<72x256xf32, #tpu.memory_space<vmem>>, vector<8x256xf32>,
    %179 = vector.extract_strided_slice %129 {offsets = [0, 18], sizes = [8, 256], strides = [1, 1]} : vector<8x290xf32> to vector<8x256xf32>
    %c1_i32_80 = arith.constant 1 : i32
    %180 = vector.broadcast %c1_i32_80 : i32 to vector<1x256xi32>
    %181 = arith.addi %16, %180 : vector<1x256xi32>
    %c0_i32_81 = arith.constant 0 : i32
    %182 = vector.broadcast %c0_i32_81 : i32 to vector<1x256xi32>
    %183 = arith.cmpi sge, %181, %182 : vector<1x256xi32>
    %c1_i32_82 = arith.constant 1 : i32
    %184 = vector.broadcast %c1_i32_82 : i32 to vector<1x256xi32>
    %185 = arith.addi %16, %184 : vector<1x256xi32>
    %c16_i32_83 = arith.constant 16 : i32
    %186 = vector.broadcast %c16_i32_83 : i32 to vector<1x256xi32>
    %187 = arith.cmpi slt, %185, %186 : vector<1x256xi32>
    %188 = arith.andi %183, %187 : vector<1x256xi1>
    %cst_84 = arith.constant 0.000000e+00 : f32
    %189 = vector.shape_cast %188 : vector<1x256xi1> to vector<1x256xi1>
    %190 = vector.broadcast %189 : vector<1x256xi1> to vector<8x256xi1>
    %191 = vector.broadcast %cst_84 : f32 to vector<8x256xf32>
    %192 = arith.select %190, %179, %191 : vector<8x256xi1>, vector<8x256xf32>
    %c40 = arith.constant 40 : index
    %c0_85 = arith.constant 0 : index
    %193 = vector.load %arg12[%c40, %c0_85] : memref<72x256xf32, #tpu.memory_space<vmem>>, vector<8x256xf32>
    tpu.vector_store %arg12[%c40, %c0_85], %192 {strides = array<i32>} : memref<72x256xf32, #tpu.memory_space<vmem>>, vector<8x256xf32>,
    %194 = vector.extract_strided_slice %129 {offsets = [0, 32], sizes = [8, 256], strides = [1, 1]} : vector<8x290xf32> to vector<8x256xf32>
    %c-1_i32_86 = arith.constant -1 : i32
    %195 = vector.broadcast %c-1_i32_86 : i32 to vector<1x256xi32>
    %196 = arith.addi %16, %195 : vector<1x256xi32>
    %c0_i32_87 = arith.constant 0 : i32
    %197 = vector.broadcast %c0_i32_87 : i32 to vector<1x256xi32>
    %198 = arith.cmpi sge, %196, %197 : vector<1x256xi32>
    %c-1_i32_88 = arith.constant -1 : i32
    %199 = vector.broadcast %c-1_i32_88 : i32 to vector<1x256xi32>
    %200 = arith.addi %16, %199 : vector<1x256xi32>
    %c16_i32_89 = arith.constant 16 : i32
    %201 = vector.broadcast %c16_i32_89 : i32 to vector<1x256xi32>
    %202 = arith.cmpi slt, %200, %201 : vector<1x256xi32>
    %203 = arith.andi %198, %202 : vector<1x256xi1>
    %cst_90 = arith.constant 0.000000e+00 : f32
    %204 = vector.shape_cast %203 : vector<1x256xi1> to vector<1x256xi1>
    %205 = vector.broadcast %204 : vector<1x256xi1> to vector<8x256xi1>
    %206 = vector.broadcast %cst_90 : f32 to vector<8x256xf32>
    %207 = arith.select %205, %194, %206 : vector<8x256xi1>, vector<8x256xf32>
    %c48 = arith.constant 48 : index
    %c0_91 = arith.constant 0 : index
    %208 = vector.load %arg12[%c48, %c0_91] : memref<72x256xf32, #tpu.memory_space<vmem>>, vector<8x256xf32>
    tpu.vector_store %arg12[%c48, %c0_91], %207 {strides = array<i32>} : memref<72x256xf32, #tpu.memory_space<vmem>>, vector<8x256xf32>,
    %209 = vector.extract_strided_slice %129 {offsets = [0, 33], sizes = [8, 256], strides = [1, 1]} : vector<8x290xf32> to vector<8x256xf32>
    %c56 = arith.constant 56 : index
    %c0_92 = arith.constant 0 : index
    %210 = vector.load %arg12[%c56, %c0_92] : memref<72x256xf32, #tpu.memory_space<vmem>>, vector<8x256xf32>
    tpu.vector_store %arg12[%c56, %c0_92], %209 {strides = array<i32>} : memref<72x256xf32, #tpu.memory_space<vmem>>, vector<8x256xf32>,
    %211 = vector.extract_strided_slice %129 {offsets = [0, 34], sizes = [8, 256], strides = [1, 1]} : vector<8x290xf32> to vector<8x256xf32>
    %c1_i32_93 = arith.constant 1 : i32
    %212 = vector.broadcast %c1_i32_93 : i32 to vector<1x256xi32>
    %213 = arith.addi %16, %212 : vector<1x256xi32>
    %c0_i32_94 = arith.constant 0 : i32
    %214 = vector.broadcast %c0_i32_94 : i32 to vector<1x256xi32>
    %215 = arith.cmpi sge, %213, %214 : vector<1x256xi32>
    %c1_i32_95 = arith.constant 1 : i32
    %216 = vector.broadcast %c1_i32_95 : i32 to vector<1x256xi32>
    %217 = arith.addi %16, %216 : vector<1x256xi32>
    %c16_i32_96 = arith.constant 16 : i32
    %218 = vector.broadcast %c16_i32_96 : i32 to vector<1x256xi32>
    %219 = arith.cmpi slt, %217, %218 : vector<1x256xi32>
    %220 = arith.andi %215, %219 : vector<1x256xi1>
    %cst_97 = arith.constant 0.000000e+00 : f32
    %221 = vector.shape_cast %220 : vector<1x256xi1> to vector<1x256xi1>
    %222 = vector.broadcast %221 : vector<1x256xi1> to vector<8x256xi1>
    %223 = vector.broadcast %cst_97 : f32 to vector<8x256xf32>
    %224 = arith.select %222, %211, %223 : vector<8x256xi1>, vector<8x256xf32>
    %c64 = arith.constant 64 : index
    %c0_98 = arith.constant 0 : index
    %225 = vector.load %arg12[%c64, %c0_98] : memref<72x256xf32, #tpu.memory_space<vmem>>, vector<8x256xf32>
    tpu.vector_store %arg12[%c64, %c0_98], %224 {strides = array<i32>} : memref<72x256xf32, #tpu.memory_space<vmem>>, vector<8x256xf32>,
    %c0_99 = arith.constant 0 : index
    %c0_100 = arith.constant 0 : index
    %226 = vector.load %arg5[%c0_99, %c0_100] : memref<8x72xf32, #tpu.memory_space<vmem>>, vector<8x72xf32>
    %c0_101 = arith.constant 0 : index
    %c0_102 = arith.constant 0 : index
    %227 = vector.load %arg12[%c0_101, %c0_102] : memref<72x256xf32, #tpu.memory_space<vmem>>, vector<72x256xf32>
    %cst_103 = arith.constant dense<0.000000e+00> : vector<8x256xf32>
    %228 = tpu.matmul %226, %227, %cst_103 {dimension_numbers = #tpu.dot_dimension_numbers<[1], [0], [0], [1], [0, 0, 1, 1], [], []>} : vector<8x72xf32>, vector<72x256xf32>, vector<8x256xf32> -> vector<8x256xf32>
    %c0_104 = arith.constant 0 : index
    %c0_105 = arith.constant 0 : index
    %229 = vector.load %arg6[%c0_104, %c0_105] : memref<8x1xf32, #tpu.memory_space<vmem>>, vector<8x1xf32>
    %230 = vector.broadcast %229 : vector<8x1xf32> to vector<8x256xf32>
    %231 = arith.mulf %228, %230 : vector<8x256xf32>
    %c0_106 = arith.constant 0 : index
    %c0_107 = arith.constant 0 : index
    %232 = vector.load %arg7[%c0_106, %c0_107] : memref<8x1xf32, #tpu.memory_space<vmem>>, vector<8x1xf32>
    %233 = vector.broadcast %232 : vector<8x1xf32> to vector<8x256xf32>
    %234 = arith.addf %231, %233 : vector<8x256xf32>
    %cst_108 = arith.constant 0.000000e+00 : f32
    %235 = vector.broadcast %cst_108 : f32 to vector<8x256xf32>
    %236 = arith.maximumf %234, %235 : vector<8x256xf32>
    %c0_109 = arith.constant 0 : index
    %c0_110 = arith.constant 0 : index
    %237 = vector.load %arg8[%c0_109, %c0_110] : memref<8x4xf32, #tpu.memory_space<vmem>>, vector<8x4xf32>
    %cst_111 = arith.constant dense<0.000000e+00> : vector<8x256xf32>
    %238 = tpu.matmul %237, %18, %cst_111 {dimension_numbers = #tpu.dot_dimension_numbers<[1], [0], [0], [1], [0, 0, 1, 1], [], []>} : vector<8x4xf32>, vector<4x256xf32>, vector<8x256xf32> -> vector<8x256xf32>
    %c0_112 = arith.constant 0 : index
    %c0_113 = arith.constant 0 : index
    %239 = vector.load %arg9[%c0_112, %c0_113] : memref<8x1xf32, #tpu.memory_space<vmem>>, vector<8x1xf32>
    %240 = vector.broadcast %239 : vector<8x1xf32> to vector<8x256xf32>
    %241 = arith.addf %238, %240 : vector<8x256xf32>
    %242 = arith.addf %236, %241 : vector<8x256xf32>
    %c0_114 = arith.constant 0 : index
    %c0_115 = arith.constant 0 : index
    %c0_116 = arith.constant 0 : index
    %243 = vector.load %arg10[%c0_114, %c0_115, %c0_116] : memref<1x8x256xf32, #tpu.memory_space<vmem>>, vector<1x8x256xf32>
    %244 = vector.shape_cast %243 : vector<1x8x256xf32> to vector<8x256xf32>
    %245 = vector.shape_cast %242 : vector<8x256xf32> to vector<1x8x256xf32>
    tpu.vector_store %arg10[%c0_114, %c0_115, %c0_116], %245 {strides = array<i32>} : memref<1x8x256xf32, #tpu.memory_space<vmem>>, vector<1x8x256xf32>,
    return
  }
  func.func @transform_0(%arg0: i32) -> (i32, i32, i32) {
    %c0_i32 = arith.constant 0 : i32
    %c0_i32_0 = arith.constant 0 : i32
    %c0_i32_1 = arith.constant 0 : i32
    return %arg0, %c0_i32, %c0_i32_0 : i32, i32, i32
  }
  func.func @transform_1(%arg0: i32) -> (i32, i32) {
    %c0_i32 = arith.constant 0 : i32
    %c0_i32_0 = arith.constant 0 : i32
    %c0_i32_1 = arith.constant 0 : i32
    return %c0_i32, %c0_i32_0 : i32, i32
  }
  func.func @transform_2(%arg0: i32) -> (i32, i32) {
    %c0_i32 = arith.constant 0 : i32
    %c0_i32_0 = arith.constant 0 : i32
    %c0_i32_1 = arith.constant 0 : i32
    return %c0_i32, %c0_i32_0 : i32, i32
  }
  func.func @transform_3(%arg0: i32) -> (i32, i32) {
    %c0_i32 = arith.constant 0 : i32
    %c0_i32_0 = arith.constant 0 : i32
    %c0_i32_1 = arith.constant 0 : i32
    return %c0_i32, %c0_i32_0 : i32, i32
  }
  func.func @transform_4(%arg0: i32) -> (i32, i32) {
    %c0_i32 = arith.constant 0 : i32
    %c0_i32_0 = arith.constant 0 : i32
    %c0_i32_1 = arith.constant 0 : i32
    return %c0_i32, %c0_i32_0 : i32, i32
  }
  func.func @transform_5(%arg0: i32) -> (i32, i32) {
    %c0_i32 = arith.constant 0 : i32
    %c0_i32_0 = arith.constant 0 : i32
    %c0_i32_1 = arith.constant 0 : i32
    return %c0_i32, %c0_i32_0 : i32, i32
  }
  func.func @transform_6(%arg0: i32) -> (i32, i32) {
    %c0_i32 = arith.constant 0 : i32
    %c0_i32_0 = arith.constant 0 : i32
    %c0_i32_1 = arith.constant 0 : i32
    return %c0_i32, %c0_i32_0 : i32, i32
  }
  func.func @transform_7(%arg0: i32) -> (i32, i32) {
    %c0_i32 = arith.constant 0 : i32
    %c0_i32_0 = arith.constant 0 : i32
    %c0_i32_1 = arith.constant 0 : i32
    return %c0_i32, %c0_i32_0 : i32, i32
  }
  func.func @transform_8(%arg0: i32) -> (i32, i32) {
    %c0_i32 = arith.constant 0 : i32
    %c0_i32_0 = arith.constant 0 : i32
    %c0_i32_1 = arith.constant 0 : i32
    return %c0_i32, %c0_i32_0 : i32, i32
  }
  func.func @transform_9(%arg0: i32) -> (i32, i32, i32) {
    %c0_i32 = arith.constant 0 : i32
    %c0_i32_0 = arith.constant 0 : i32
    %c0_i32_1 = arith.constant 0 : i32
    return %arg0, %c0_i32, %c0_i32_0 : i32, i32, i32
  }
}

</mosaic_0001>

<bundles_post_ra>
// kernel: tpu_custom_call.1
= control target key start
LH: loop header
LB: loop body
LE: loop exit
PB: predicated region body
PF: predicated region fallthrough
CT: control target
= control target key end

     0   :  { %14 = vsyncpa [#allocation5], 0  ;;  %s1567_s0 = inlined_call_operand.vmem [shape: f32[2,4,256], index: 0, kind: input, shape index: {}]   ;;  %s1568_s1 = inlined_call_operand.vmem [shape: f32[8,36], index: 1, kind: input, shape index: {}]   ;;  %s1569_s2 = inlined_call_operand.vmem [shape: f32[8,1], index: 2, kind: input, shape index: {}]   ;;  %s1570_s3 = inlined_call_operand.vmem [shape: f32[8,1], index: 3, kind: input, shape index: {}]   ;;  %s1571_s4 = inlined_call_operand.vmem [shape: f32[8,72], index: 4, kind: input, shape index: {}]   ;;  %s1572_s5 = inlined_call_operand.vmem [shape: f32[8,1], index: 5, kind: input, shape index: {}]   ;;  %s1573_s6 = inlined_call_operand.vmem [shape: f32[8,1], index: 6, kind: input, shape index: {}]   ;;  %s1574_s7 = inlined_call_operand.vmem [shape: f32[8,4], index: 7, kind: input, shape index: {}]   ;;  %s1575_s8 = inlined_call_operand.vmem [shape: f32[8,1], index: 8, kind: input, shape index: {}]   ;;  %s1576_s9 = inlined_call_operand.hbm [shape: f32[2,8,256], index: 9, kind: output, shape index: {}]  }
   0x1   :  { %16 = vsyncpa [#allocation5 + $0x1], 0  ;;  %s1252_s30 = smov 0   ;;  %s1254_s10 = smov 0  }
   0x2   :  { %s1256_s11 = smov 0   ;;  %s1258_s12 = smov 0  }
   0x3 LB: > { %s1273_s13 = sadd.s32 4294967295, %s1188_s12   ;;  %s1042_s14 = sadd.s32 4294967294, %s1188_s12   ;;  %s1188_s12 = sphi %s1258_s12, %s1585_s12   ;;  %s1184_s11 = sphi %s1256_s11, %s1584_s11   ;;  %s1180_s10 = sphi %s1254_s10, %s1583_s10   ;;  %s1176_s30 = sphi %s1252_s30, %s1582_s30  }
   0x4   : > { %s1277_s15 = sadd.s32 1, %s1188_s12   ;;  %s223_s16 = sadd.s32 1, %s1184_s11 }
   0x5   : > { %s220_s17 = ssub.s32 %s1188_s12, %s1277_s15  ;;  %p233_p0 = scmp.ne.s32.totalorder %s1184_s11, %s1180_s10 }
   0x6   : > { %p221_p1 = scmp.eq.s32.totalorder %s220_s17, 0  ;;  %p234_p2 = scmp.eq.s32.totalorder %s1273_s13, 1 }
   0x7   : > { %p239_p3 = scmp.ne.s32.totalorder %s1180_s10, %s1176_s30  ;;  %p240_p4 = scmp.eq.s32.totalorder %s1042_s14, 1 }
   0x8   : > { %s1288_s18 = scalar_select %p221_p1, %s1184_s11, %s223_s16  }
   0x9   : > { %p1290_p5 = por %p234_p2, %p233_p0  ;;  %p1294_p6 = por %p240_p4, %p239_p3 }
   0xa   : > { %p1045_p7 = scmp.ge.s32.totalorder %s1188_s12, 1  ;;  %p290_p8 = scmp.lt.s32.totalorder %s1188_s12, 3 }
   0xc   : > { %p291_p9 = pnand %p1045_p7, %p290_p8 }
   0xd   : > { %p326_p10 = scmp.lt.s32.totalorder (!%p291_p9), %s1273_s13, 1  ;;  %s1190_s26 = smov (!%p291_p9), 17  }
   0xe   : > { %294 = sbr.rel (%p291_p9) target bundleno = 1008 (0x3f0), region = 56  ;;  %s1191_s27 = smov (!%p291_p9), 110  }
   0xf   : > { %s1192_s28 = smov (!%p291_p9), 94   ;;  %s1193_s29 = smov (!%p291_p9), 111  }
  0x10   : > { %s1194_s14 = smov (!%p291_p9), 96   ;;  %s1195_s16 = smov (!%p291_p9), 112  }
  0x11   : > { %s1577_s17 = smov (!%p291_p9), 126   ;;  %s323_s23 = sand.u32 (!%p291_p9), 1, %s1180_s10  }
  0x12   : > { %s1046_s24 = sshll.u32 (!%p291_p9), %s323_s23, 4 }
  0x13   : > { %s327_s21 = scalar_select %p326_p10, %s1273_s13, 1  ;;  %v331_v2 = vlaneseq  ;;  %vm365_vm0 = vcmask 138240   ;;  %v1199_v19 = vmov 0.0   ;;  %v624_v20 = vld [vmem:[%s1569_s2] sm:$0xff]  ;;  %v1200_v21 = vmov 0  }
  0x14   : > { %617 = vmatprep.mubr.f32.mxu0 %v1199_v19  ;;  %853 = vmatprep.mubr.f32.mxu1 %v1199_v19  ;;  %v632_v22 = vld [vmem:[%s1570_s3] sm:$0xff]  ;;  %vm522_vm3 = vcmask 769024   ;;  %vm473_vm6 = vcmask 900096   ;;  %vm494_vm7 = vcmask 785408   ;;  %vm546_vm8 = vcmask 1043456  }
  0x15   : > { %s1061_s22 = sshll.u32 %s327_s21, 3  ;;  %v1315_v3 = vand.u32 127, %v331_v2  ;;  %s1197_s21 = smov 95   ;;  %1125 = vset.pattern.permute.xlu0 %v1200_v21  ;;  %1126 = vset.pattern.permute.xlu1 %v1200_v21  ;;  %vm439_vm9 = vcmask 916480   ;;  %vm460_vm10 = vcmask 908288   ;;  %vm424_vm11 = vcmask 1031168  }
  0x16   : > { %s330_s25 = scalar_lea.vmem %s1567_s0, %s1061_s22  ;;  %s1198_s22 = smov 127   ;;  %vm509_vm12 = vcmask 777216   ;;  %vm399_vm13 = vcmask 1039360   ;;  %vm542_vm14 = vcmask 293888   ;;  %vm885_vm15 = vcmask 31744  }
  0x17   : > { %v1305_v0 = vld [vmem:[%s330_s25] sm:$0xff]  ;;  %v338_v4 = vand.u32 15, %v1315_v3  ;;  %v1319_v5 = vadd.s32 128, %v1315_v3  ;;  %s1062_s25 = sshll.u32 %s1273_s13, 8  ;;  %s1201_s13 = smov [#allocation4]  }
  0x18   : > { %361 = vrot.lane.b32.xlu0 %v1305_v0, %s1190_s26  ;;  %v1311_v1 = vcombine.high %v1305_v0, %v1305_v0 }
  0x19   : > { %v345_v6 = vand.u32 15, %v1319_v5  ;;  %v1324_v7 = vadd.s32 4294967295, %v338_v4  ;;  %v1373_v25 = vadd.s32 1, %v338_v4 }
  0x1b   : > { %v1328_v8 = vadd.s32 4294967295, %v345_v6  ;;  %vm374_vm1 = vcmp.ge.s32.totalorder %v1324_v7, 0  ;;  %vm410_vm4 = vcmp.lt.s32.totalorder %v1373_v25, 16  ;;  %v1378_v28 = vadd.s32 1, %v345_v6 }
  0x1c   : > { %363 = vrot.lane.b32.xlu0 %v1311_v1, %s1190_s26 }
  0x1d   : > { %vm375_vm2 = vcmp.ge.s32.totalorder %v1328_v8, 0  ;;  %vm411_vm5 = vcmp.lt.s32.totalorder %v1378_v28, 16 }
  0x8a   : > { %v362_v9 = vpop.permute.xlu0 %361 }
  0x8b   : > { %v370_v10 = vsel %vm365_vm0, 0.0, %v362_v9 }
  0x8c   : > { %467 = vrot.lane.b32.xlu1 %v370_v10, %s1191_s27  ;;  %516 = vrot.lane.b32.xlu0 %v370_v10, %s1192_s28  ;;  %v384_v11 = vsel %vm374_vm1, %v370_v10, 0.0  ;;  %v390_v16 = vrot.slane %v370_v10, 4 }
  0x8d   : > { %386 = vst [vmem:[#allocation2 + $0x30] sm:$0xf] %v384_v11 }
  0x8e   : > { %v364_v12 = vpop.permute.xlu0 %363 }
  0x8f   : > { %v366_v13 = vsel %vm365_vm0, %v362_v9, %v364_v12  ;;  %v371_v15 = vsel %vm365_vm0, %v364_v12, 0.0 }
  0x90   : > { %454 = vrot.lane.b32.xlu1 %v370_v10, %s1193_s29  ;;  %488 = vrot.lane.b32.xlu0 %v370_v10, %s1194_s14  ;;  %v385_v14 = vsel %vm375_vm2, %v366_v13, 0.0  ;;  %v392_v17 = vrot.slane %v371_v15, 4  ;;  %v391_v18 = vrot.slane %v366_v13, 4 }
  0x91   : > { %387 = vst [vmem:[#allocation2] sm:$0xf] %v385_v14 }
  0x94   : > { %433 = vrot.lane.b32.xlu0 %v370_v10, %s1195_s16  ;;  %518 = vrot.lane.b32.xlu1 %v366_v13, %s1192_s28 }
  0x98   : > { %471 = vrot.lane.b32.xlu0 %v371_v15, %s1191_s27  ;;  %520 = vrot.lane.b32.xlu1 %v371_v15, %s1192_s28 }
  0x9c   : > { %492 = vrot.lane.b32.xlu0 %v371_v15, %s1194_s14  ;;  %469 = vrot.lane.b32.xlu1 %v366_v13, %s1191_s27 }
  0xa0   : > { %437 = vrot.lane.b32.xlu0 %v371_v15, %s1195_s16  ;;  %490 = vrot.lane.b32.xlu1 %v366_v13, %s1194_s14 }
  0xa4   : > { %458 = vrot.lane.b32.xlu0 %v371_v15, %s1193_s29  ;;  %435 = vrot.lane.b32.xlu1 %v366_v13, %s1195_s16 }
  0xa8   : > { %422 = vrot.lane.b32.xlu0 %v371_v15, %s1577_s17  ;;  %503 = vrot.lane.b32.xlu1 %v390_v16, %s1197_s21 }
  0xac   : > { %507 = vrot.lane.b32.xlu0 %v392_v17, %s1197_s21  ;;  %456 = vrot.lane.b32.xlu1 %v366_v13, %s1193_s29 }
  0xb0   : > { %418 = vrot.lane.b32.xlu0 %v370_v10, %s1577_s17  ;;  %420 = vrot.lane.b32.xlu1 %v366_v13, %s1577_s17 }
  0xb4   : > { %397 = vrot.lane.b32.xlu0 %v392_v17, %s1198_s22  ;;  %505 = vrot.lane.b32.xlu1 %v391_v18, %s1197_s21 }
  0xb8   : > { %395 = vrot.lane.b32.xlu1 %v391_v18, %s1198_s22  ;;  %627 = vperm.xlu0 %1125, %v624_v20  }
  0xbc   : > { %393 = vrot.lane.b32.xlu1 %v390_v16, %s1198_s22 }
  0xc0   : > { %635 = vperm.xlu1 %1126, %v632_v22  }
  0xfe   : > { %v468_v23 = vpop.permute.xlu1 %467  ;;  %v517_v24 = vpop.permute.xlu0 %516 }
 0x102   : > { %v455_v26 = vpop.permute.xlu1 %454  ;;  %v489_v27 = vpop.permute.xlu0 %488 }
 0x106   : > { %v519_v29 = vpop.permute.xlu1 %518  ;;  %v434_v30 = vpop.permute.xlu0 %433 }
 0x107   : > { %v523_v31 = vsel %vm522_vm3, %v517_v24, %v519_v29 }
 0x108   : > { %v527_v32 = vsel %vm410_vm4, %v523_v31, 0.0  ;;  %v531_v31 = vld [vmem:[%s1568_s1] sm:$0xff] }
 0x109   : > { %529 = vst [vmem:[#allocation2 + $0x40] sm:$0xf] %v527_v32 }
 0x10a   : > { %v521_v33 = vpop.permute.xlu1 %520  ;;  %v472_v34 = vpop.permute.xlu0 %471 }
 0x10b   : > { %v524_v35 = vsel %vm522_vm3, %v519_v29, %v521_v33  ;;  %v878_v33 = vld [vmem:[%s1574_s7] sm:$0xff] }
 0x10c   : > { %v528_v36 = vsel %vm411_vm5, %v524_v35, 0.0 }
 0x10d   : > { %530 = vst [vmem:[#allocation2 + $0x38] sm:$0xf] %v528_v36 }
 0x10e   : > { %v470_v37 = vpop.permute.xlu1 %469  ;;  %v493_v38 = vpop.permute.xlu0 %492 }
 0x10f   : > { %v474_v39 = vsel %vm473_vm6, %v468_v23, %v470_v37  ;;  %v475_v40 = vsel %vm473_vm6, %v470_v37, %v472_v34 }
 0x110   : > { %v478_v41 = vsel %vm410_vm4, %v474_v39, 0.0  ;;  %v479_v42 = vsel %vm411_vm5, %v475_v40, 0.0  ;;  %v540_v52 = vld [vmem:[#allocation2 + $0x40] sm:$0xf] }
 0x111   : > { %v482_v43 = vrot.slane %v478_v41, 4  ;;  %v483_v44 = vrot.slane %v479_v42, 4 }
 0x112   : > { %v491_v45 = vpop.permute.xlu1 %490  ;;  %v438_v46 = vpop.permute.xlu0 %437 }
 0x113   : > { %486 = vst [vmem:[#allocation2 + $0x48] sm:$0xf0] %v482_v43  ;;  %487 = vst [vmem:[#allocation2 + $0x28] sm:$0xf0] %v483_v44  ;;  %v495_v47 = vsel %vm494_vm7, %v489_v27, %v491_v45  ;;  %v496_v48 = vsel %vm494_vm7, %v491_v45, %v493_v38 }
 0x114   : > { %v499_v49 = vsel %vm374_vm1, %v495_v47, 0.0  ;;  %v500_v50 = vsel %vm375_vm2, %v496_v48, 0.0  ;;  %v541_v51 = vld [vmem:[#allocation2 + $0x38] sm:$0xf]  ;;  %v860_v47 = vld [vmem:[%s1572_s5] sm:$0xff] }
 0x115   : > { %501 = vst [vmem:[#allocation2 + $0x8] sm:$0xf] %v499_v49  ;;  %502 = vst [vmem:[#allocation2 + $0x20] sm:$0xf] %v500_v50  ;;  %1049 = vmatprep.subr.msk.mxu0 %vm546_vm8, %v541_v51  ;;  %v879_v48 = vld [vmem:[%s1575_s8] sm:$0xff] }
 0x116   : > { %v436_v53 = vpop.permute.xlu1 %435  ;;  %1050 = vmatpush1.msk.msra.mxu0 %vm546_vm8, %v540_v52  ;;  %v459_v54 = vpop.permute.xlu0 %458 }
 0x117   : > { %v440_v55 = vsel %vm439_vm9, %v434_v30, %v436_v53  ;;  %v441_v56 = vsel %vm439_vm9, %v436_v53, %v438_v46  ;;  %v868_v46 = vld [vmem:[%s1573_s6] sm:$0xff] }
 0x118   : > { %v444_v57 = vsel %vm374_vm1, %v440_v55, 0.0  ;;  %v445_v58 = vsel %vm375_vm2, %v441_v56, 0.0 }
 0x119   : > { %v448_v59 = vrot.slane %v444_v57, 4  ;;  %v449_v60 = vrot.slane %v445_v58, 4 }
 0x11a   : > { %v504_v61 = vpop.permute.xlu1 %503  ;;  %v423_v62 = vpop.permute.xlu0 %422 }
 0x11b   : > { %452 = vst [vmem:[#allocation2 + $0x18] sm:$0xf0] %v448_v59  ;;  %453 = vst [vmem:[#allocation2 + $0x10] sm:$0xf0] %v449_v60 }
 0x11e   : > { %v457_v63 = vpop.permute.xlu1 %456  ;;  %v508_v2 = vpop.permute.xlu0 %507 }
 0x11f   : > { %v461_v3 = vsel %vm460_vm10, %v455_v26, %v457_v63  ;;  %v462_v4 = vsel %vm460_vm10, %v457_v63, %v459_v54 }
 0x120   : > { %465 = vst [vmem:[#allocation2 + $0x48] sm:$0xf] %v461_v3  ;;  %466 = vst [vmem:[#allocation2 + $0x28] sm:$0xf] %v462_v4 }
 0x122   : > { %v421_v5 = vpop.permute.xlu1 %420  ;;  %v419_v6 = vpop.permute.xlu0 %418 }
 0x123   : > { %v426_v9 = vsel %vm424_vm11, %v421_v5, %v423_v62  ;;  %v425_v10 = vsel %vm424_vm11, %v419_v6, %v421_v5 }
 0x124   : > { %v430_v11 = vsel %vm411_vm5, %v426_v9, 0.0  ;;  %v429_v12 = vsel %vm410_vm4, %v425_v10, 0.0 }
 0x125   : > { %432 = vst [vmem:[#allocation2 + $0x10] sm:$0xf] %v430_v11  ;;  %431 = vst [vmem:[#allocation2 + $0x18] sm:$0xf] %v429_v12 }
 0x126   : > { %v506_v13 = vpop.permute.xlu1 %505  ;;  %v398_v16 = vpop.permute.xlu0 %397 }
 0x127   : > { %v510_v14 = vsel %vm509_vm12, %v504_v61, %v506_v13  ;;  %v511_v15 = vsel %vm509_vm12, %v506_v13, %v508_v2  ;;  %v537_v24 = vld [vmem:[#allocation2 + $0x28] sm:$0xff] }
 0x128   : > { %514 = vst [vmem:[#allocation2 + $0x8] sm:$0xf0] %v510_v14  ;;  %515 = vst [vmem:[#allocation2 + $0x20] sm:$0xf0] %v511_v15  ;;  %v536_v26 = vld [vmem:[#allocation2 + $0x48] sm:$0xff] }
 0x12a   : > { %v396_v17 = vpop.permute.xlu1 %395 }
 0x12b   : > { %v401_v18 = vsel %vm399_vm13, %v396_v17, %v398_v16 }
 0x12c   : > { %405 = vst [vmem:[#allocation2] sm:$0xf0] %v401_v18  ;;  %v535_v27 = vld [vmem:[#allocation2 + $0x10] sm:$0xff]  ;;  %v534_v29 = vld [vmem:[#allocation2 + $0x18] sm:$0xff] }
 0x12e   : > { %v394_v20 = vpop.permute.xlu1 %393 }
 0x12f   : > { %v400_v21 = vsel %vm399_vm13, %v394_v20, %v396_v17  ;;  %v539_v22 = vld [vmem:[#allocation2 + $0x20] sm:$0xff]  ;;  %v538_v23 = vld [vmem:[#allocation2 + $0x8] sm:$0xff] }
 0x130   : > { %404 = vst [vmem:[#allocation2 + $0x30] sm:$0xf0] %v400_v21  ;;  %577 = vmatprep.subr.mxu0 %v539_v22 }
 0x131   : > { %578 = vmatpush1.msra.mxu0 %v538_v23 }
 0x132   : > { %579 = vmatprep.subr.mxu0 %v537_v24 }
 0x133   : > { %580 = vmatpush1.msra.mxu0 %v536_v26  ;;  %v533_v30 = vld [vmem:[#allocation2] sm:$0xff]  ;;  %v628_v34 = vpop.permute.xlu0 %627 }
 0x134   : > { %581 = vmatprep.subr.mxu0 %v535_v27 }
 0x135   : > { %582 = vmatpush1.msra.mxu0 %v534_v29 }
 0x136   : > { %583 = vmatprep.subr.mxu0 %v533_v30 }
 0x137   : > { %v532_v32 = vld [vmem:[#allocation2 + $0x30] sm:$0xff] }
 0x138   : > { %584 = vmatpush1.msra.mxu0 %v532_v32  ;;  %v766_v32 = vld [vmem:[%s1571_s4] sm:$0xff] }
 0x139   : > { %1051 = vmatmul.mubr.msk.f32.vlgmr.msra.gmra.mxu0 %vm542_vm14, %v531_v31  ;;  %1053 = vmatprep.subr.msk.mxu0 %vm546_vm8, %v1311_v1 }
 0x13a   : > { %1054 = vmatpush1.msk.msra.mxu0 %vm546_vm8, %v1305_v0  ;;  %957 = vmatprep.mubr.f32.mxu0 %v1199_v19 }
 0x13b   : > { %v636_v36 = vpop.permute.xlu1 %635 }
 0x13d   : > { %1055 = vmatmul.mubr.msk.f32.vlgmr.msra.gmra.mxu0 %vm885_vm15, %v878_v33 }
 0x1f9   : > { %v619_v35 = vpop.f32.mrf.mxu0 }
 0x1fa   : > { %v630_v37 = vmul.f32 %v628_v34, %v619_v35 }
 0x1fb   : > { %v621_v38 = vpop.f32.mrf.mxu0 }
 0x1fc   : > { %v638_v39 = vadd.f32 %v636_v36, %v630_v37  ;;  %v631_v40 = vmul.f32 %v628_v34, %v621_v38 }
 0x1fd   : > { %v959_v28 = vpop.f32.mrf.mxu0 }
 0x1fe   : > { %v640_v41 = vmax.f32 %v638_v39, 0.0  ;;  %v639_v1 = vadd.f32 %v636_v36, %v631_v40 }
 0x1ff   : > { %v961_v40 = vpop.f32.mrf.mxu0 }
 0x200   : > { %v641_v42 = vmax.f32 %v639_v1, 0.0  ;;  %644 = vrot.lane.b32.xlu1 %v640_v41, %s1190_s26 }
 0x202   : > { %646 = vrot.lane.b32.xlu0 %v641_v42, %s1190_s26  ;;  %s1581_s26 = smov 126  }
 0x272   : > { %v645_v0 = vpop.permute.xlu1 %644 }
 0x273   : > { %v1433_v19 = vsel %vm365_vm0, 0.0, %v645_v0 }
 0x274   : > { %740 = vrot.lane.b32.xlu0 %v1433_v19, %s1197_s21  ;;  %752 = vrot.lane.b32.xlu1 %v1433_v19, %s1192_s28  ;;  %v647_v43 = vpop.permute.xlu0 %646 }
 0x275   : > { %v653_v44 = vsel %vm365_vm0, %v647_v43, 0.0  ;;  %v1452_v45 = vsel %vm365_vm0, %v645_v0, %v647_v43  ;;  %vm785_vm0 = vcmask 588800  }
 0x278   : > { %712 = vrot.lane.b32.xlu0 %v1433_v19, %s1191_s27  ;;  %726 = vrot.lane.b32.xlu1 %v1433_v19, %s1194_s14 }
 0x27c   : > { %686 = vrot.lane.b32.xlu0 %v1433_v19, %s1195_s16  ;;  %700 = vrot.lane.b32.xlu1 %v1433_v19, %s1193_s29 }
 0x280   : > { %756 = vrot.lane.b32.xlu0 %v653_v44, %s1192_s28  ;;  %672 = vrot.lane.b32.xlu1 %v1433_v19, %s1581_s26 }
 0x284   : > { %742 = vrot.lane.b32.xlu0 %v1452_v45, %s1197_s21  ;;  %754 = vrot.lane.b32.xlu1 %v1452_v45, %s1192_s28 }
 0x288   : > { %730 = vrot.lane.b32.xlu0 %v653_v44, %s1194_s14  ;;  %744 = vrot.lane.b32.xlu1 %v653_v44, %s1197_s21 }
 0x28c   : > { %714 = vrot.lane.b32.xlu0 %v1452_v45, %s1191_s27  ;;  %728 = vrot.lane.b32.xlu1 %v1452_v45, %s1194_s14  ;;  %s981_s14 = scalar_lea.hbm %s1576_s9, %s1062_s25 }
 0x290   : > { %704 = vrot.lane.b32.xlu0 %v653_v44, %s1193_s29  ;;  %716 = vrot.lane.b32.xlu1 %v653_v44, %s1191_s27 }
 0x294   : > { %688 = vrot.lane.b32.xlu0 %v1452_v45, %s1195_s16  ;;  %702 = vrot.lane.b32.xlu1 %v1452_v45, %s1193_s29 }
 0x298   : > { %676 = vrot.lane.b32.xlu0 %v653_v44, %s1581_s26  ;;  %690 = vrot.lane.b32.xlu1 %v653_v44, %s1195_s16  ;;  %s969_s16 = scalar_lea.sflag [#allocation5], %s323_s23 }
 0x29c   : > { %662 = vrot.lane.b32.xlu0 %v1452_v45, %s1198_s22  ;;  %674 = vrot.lane.b32.xlu1 %v1452_v45, %s1581_s26  ;;  %s325_s26 = scalar_lea.vmem [#allocation4], %s1046_s24 }
 0x29d   : > { %s983_s27 = sshll.u32 %s325_s26, 4  ;;  %s984_s27 = int_to_ptr.vmem [resolvable:$true] %s983_s27 }
 0x29e   : > { %s1128_s21 = scalar_lea.vmem %s984_s27, 256 }
 0x29f   : > { %p1129_p11 = scmp.ne.s32.totalorder %s984_s27, %s1128_s21 }
 0x2a0   : > { %660 = vrot.lane.b32.xlu0 %v1433_v19, %s1198_s22  ;;  %664 = vrot.lane.b32.xlu1 %v653_v44, %s1198_s22  ;;  %s1132_s22 = sshll.u32 %s1201_s13, 4  ;;  %s1133_s22 = int_to_ptr.vmem [resolvable:$false] %s1132_s22 }
 0x2a1   : > { %p1130_p12 = pnand %p1129_p11, %p1290_p5  ;;  %s1134_s17 = scalar_lea.vmem %s1133_s22, 512 }
 0x2a2   : > { %p1135_p0 = scmp.lt.s32.totalorder %s984_s27, %s1133_s22  ;;  %p1136_p1 = scmp.lt.s32.totalorder %s1134_s17, %s1128_s21 }
 0x2a3   : > { %p1131_p13 = pneg %p1130_p12 }
 0x2a4   : > { %871 = vperm.xlu0 %1125, %v868_v46   ;;  %863 = vperm.xlu1 %1126, %v860_v47   ;;  %p1137_p2 = por %p1136_p1, %p1135_p0 }
 0x2a6   : > { %p1138_p3 = pnand %p1137_p2, %p1131_p13 }
 0x2a8   : > { %882 = vperm.xlu1 %1126, %v879_v48  }
 0x2e6   : > { %v741_v49 = vpop.permute.xlu0 %740  ;;  %v753_v50 = vpop.permute.xlu1 %752 }
 0x2ea   : > { %v713_v51 = vpop.permute.xlu0 %712  ;;  %v727_v52 = vpop.permute.xlu1 %726 }
 0x2ee   : > { %v687_v53 = vpop.permute.xlu0 %686  ;;  %v701_v54 = vpop.permute.xlu1 %700 }
 0x2f2   : > { %v757_v55 = vpop.permute.xlu0 %756  ;;  %v673_v56 = vpop.permute.xlu1 %672 }
 0x2f6   : > { %v743_v57 = vpop.permute.xlu0 %742  ;;  %v755_v58 = vpop.permute.xlu1 %754 }
 0x2f7   : > { %v759_v59 = vsel %vm522_vm3, %v755_v58, %v757_v55  ;;  %v758_v60 = vsel %vm522_vm3, %v753_v50, %v755_v58  ;;  %v746_v2 = vsel %vm509_vm12, %v741_v49, %v743_v57 }
 0x2f8   : > { %1063 = vmatprep.subr.msk.mxu1 %vm411_vm5, %v759_v59 }
 0x2f9   : > { %1064 = vmatpush1.msk.msra.mxu1 %vm410_vm4, %v758_v60 }
 0x2fa   : > { %v731_v61 = vpop.permute.xlu0 %730  ;;  %v745_v62 = vpop.permute.xlu1 %744 }
 0x2fb   : > { %v747_v63 = vsel %vm509_vm12, %v743_v57, %v745_v62 }
 0x2fc   : > { %805 = vmatprep.subr.mxu1 %v747_v63 }
 0x2fd   : > { %806 = vmatpush1.msra.mxu1 %v746_v2 }
 0x2fe   : > { %v715_v3 = vpop.permute.xlu0 %714  ;;  %v729_v4 = vpop.permute.xlu1 %728 }
 0x2ff   : > { %v732_v5 = vsel %vm494_vm7, %v727_v52, %v729_v4  ;;  %v733_v6 = vsel %vm494_vm7, %v729_v4, %v731_v61  ;;  %v718_v12 = vsel %vm473_vm6, %v713_v51, %v715_v3 }
 0x300   : > { %1065 = vmatprep.subr.msk.mxu1 %vm375_vm2, %v733_v6 }
 0x301   : > { %1066 = vmatpush1.msk.msra.mxu1 %vm374_vm1, %v732_v5 }
 0x302   : > { %v705_v9 = vpop.permute.xlu0 %704  ;;  %v717_v10 = vpop.permute.xlu1 %716 }
 0x303   : > { %v719_v11 = vsel %vm473_vm6, %v715_v3, %v717_v10 }
 0x304   : > { %1067 = vmatprep.subr.msk.mxu1 %vm411_vm5, %v719_v11 }
 0x305   : > { %1068 = vmatpush1.msk.msra.mxu1 %vm410_vm4, %v718_v12 }
 0x306   : > { %v689_v13 = vpop.permute.xlu0 %688  ;;  %v703_v14 = vpop.permute.xlu1 %702 }
 0x307   : > { %v707_v15 = vsel %vm460_vm10, %v703_v14, %v705_v9  ;;  %v706_v16 = vsel %vm460_vm10, %v701_v54, %v703_v14  ;;  %v692_v21 = vsel %vm439_vm9, %v687_v53, %v689_v13 }
 0x308   : > { %811 = vmatprep.subr.mxu1 %v707_v15 }
 0x309   : > { %812 = vmatpush1.msra.mxu1 %v706_v16 }
 0x30a   : > { %v677_v17 = vpop.permute.xlu0 %676  ;;  %v691_v18 = vpop.permute.xlu1 %690 }
 0x30b   : > { %v693_v20 = vsel %vm439_vm9, %v689_v13, %v691_v18 }
 0x30c   : > { %1069 = vmatprep.subr.msk.mxu1 %vm375_vm2, %v693_v20 }
 0x30d   : > { %1070 = vmatpush1.msk.msra.mxu1 %vm374_vm1, %v692_v21 }
 0x30e   : > { %v663_v22 = vpop.permute.xlu0 %662  ;;  %v675_v23 = vpop.permute.xlu1 %674 }
 0x30f   : > { %v678_v24 = vsel %vm424_vm11, %v673_v56, %v675_v23  ;;  %v679_v26 = vsel %vm424_vm11, %v675_v23, %v677_v17 }
 0x310   : > { %1071 = vmatprep.subr.msk.mxu1 %vm411_vm5, %v679_v26 }
 0x311   : > { %1072 = vmatpush1.msk.msra.mxu1 %vm410_vm4, %v678_v24 }
 0x312   : > { %v661_v27 = vpop.permute.xlu0 %660  ;;  %v665_v29 = vpop.permute.xlu1 %664 }
 0x313   : > { %v667_v30 = vsel %vm399_vm13, %v663_v22, %v665_v29  ;;  %v666_v31 = vsel %vm399_vm13, %v661_v27, %v663_v22 }
 0x314   : > { %817 = vmatprep.subr.mxu1 %v667_v30 }
 0x315   : > { %818 = vmatpush1.msra.mxu1 %v666_v31 }
 0x316   : > { %1073 = vmatprep.subr.msk.mxu1 %vm375_vm2, %v1452_v45 }
 0x317   : > { %1074 = vmatpush1.msk.msra.mxu1 %vm374_vm1, %v1433_v19 }
 0x318   : > { %1052 = vmatmul.mubr.msk.f32.vlgmr.msra.gmra.mxu1 %vm785_vm0, %v766_v32 }
 0x31f   : > { %v864_v25 = vpop.permute.xlu1 %863  ;;  %v872_v34 = vpop.permute.xlu0 %871 }
 0x323   : > { %v883_v36 = vpop.permute.xlu1 %882 }
 0x324   : > { %v960_v8 = vadd.f32 %v959_v28, %v883_v36  ;;  %v962_v7 = vadd.f32 %v961_v40, %v883_v36 }
 0x3d8   : > { %v855_v33 = vpop.f32.mrf.mxu1 }
 0x3d9   : > { %v866_v35 = vmul.f32 %v864_v25, %v855_v33 }
 0x3da   : > { %v857_v37 = vpop.f32.mrf.mxu1 }
 0x3db   : > { %v874_v38 = vadd.f32 %v872_v34, %v866_v35  ;;  %v867_v39 = vmul.f32 %v864_v25, %v857_v37 }
 0x3dd   : > { %v876_v41 = vmax.f32 %v874_v38, 0.0  ;;  %v875_v1 = vadd.f32 %v872_v34, %v867_v39 }
 0x3df   : > { %v964_v42 = vadd.f32 %v960_v8, %v876_v41  ;;  %v877_v0 = vmax.f32 %v875_v1, 0.0 }
 0x3e1   : > { %v965_v19 = vadd.f32 %v962_v7, %v877_v0  ;;  %966 = vst [vmem:[%s325_s26] sm:$0xff] %v964_v42 }
 0x3e3   : > { %967 = vst [vmem:[%s325_s26 + $0x8] sm:$0xff] %v965_v19 }
 0x3e4   : > { %1141 = shalt.err (!%p1138_p3)
}
 0x3e5   : > { %s1142_s24 = scalar_lea.hbm %s981_s14, 256  ;;  %s1146_s26 = scalar_lea.hbm %s1576_s9, 512 }
 0x3e6   : > { %p1143_p4 = scmp.ne.s32.totalorder %s981_s14, %s1142_s24  ;;  %p1147_p9 = scmp.lt.s32.totalorder %s981_s14, %s1576_s9 }
 0x3e7   : > { %p1148_p10 = scmp.lt.s32.totalorder %s1146_s26, %s1142_s24 }
 0x3e8   : > { %p1144_p7 = pnand %p1143_p4, %p1290_p5 }
 0x3e9   : > { %p1149_p11 = por %p1148_p10, %p1147_p9 }
 0x3ea   : > { %p1145_p8 = pneg %p1144_p7 }
 0x3ec   : > { %p1150_p12 = pnand %p1149_p11, %p1145_p8 }
 0x3ee   : > { %1153 = shalt.err (!%p1150_p12)
}
 0x3ef   : > { %1075 = dma.vmem_to_hbm [thread:$0]  (%p1290_p5), %s984_s27, 256, %s981_s14, %s969_s16  }
 0x3f0 PF: > { %p1081_p13 = scmp.ge.s32.totalorder %s1188_s12, 2  ;;  %s995_s21 = sand.u32 1, %s1176_s30  }
 0x3f1   : > { %s996_s13 = scalar_lea.sflag [#allocation5], %s995_s21 }
 0x3f2   : > { %p1078_p0 = pnand %p1081_p13, %p1294_p6 }
 0x3f4   : > { %p1079_p1 = pneg %p1078_p0 }
 0x3f6   : > { %1171 = dma.done.wait (%p1079_p1), %s996_s13, 256  }
 0x3f7   : > { %1173 = vsyncadd (%p1079_p1), %s996_s13, 4294967040  ;;  %p19_p2 = scmp.ge.s32.totalorder %s1277_s15, 4   ;;  %s1582_s30 = smov %s1180_s10 }
 0x3f8   : > { %s1583_s10 = smov %s1184_s11  ;;  %s1584_s11 = smov %s1288_s18 }
 0x3f9   : > { %s1585_s12 = smov %s1277_s15  ;;  %21 = sbr.rel (!%p19_p2) target bundleno = 3 (0x3), region = 91 }
 0x3fe   :  { %1001 = vsyncpa [#allocation5], 1 }
 0x3ff   :  { %1003 = vsyncpa [#allocation5 + $0x1], 1 }

</bundles_post_ra>
